<compile_context>
chip_gen: v7x
topology: tpu7x:2x2x1
jax: 0.10.0
libtpu: 0.0.40
codegen_flags: <defaults>
</compile_context>

<pallas_src>
import functools

import jax
import jax.numpy as jnp
from jax.experimental import pallas as pl
from jax.experimental.pallas import tpu as pltpu


def _round_up(x, m):
    return (x + m - 1) // m * m


def _target_size(org_h, org_w, short_edge_size):
    """New (h, w) with the same int() truncation as the PyTorch reference."""
    aspect_ratio = org_h / org_w
    if org_h > org_w:
        new_w = short_edge_size
        new_h = int(aspect_ratio * new_w)
    else:
        new_h = short_edge_size
        new_w = int(new_h / aspect_ratio)
    return new_h, new_w


def _bilinear_matrix(in_size, out_size, pad_out=None):
    """Dense (pad_out or out_size, in_size) bilinear matrix; rows >= out_size are zero.

    Half-pixel centers (align_corners=False), clamped edges — matches
    torch.nn.functional.interpolate(mode="bilinear", align_corners=False)
    applied separably (torchvision F.resize without antialias).
    """
    n_rows = out_size if pad_out is None else pad_out
    scale = in_size / out_size
    out_coords = (jnp.arange(out_size, dtype=jnp.float32) + 0.5) * scale - 0.5
    x0f = jnp.floor(out_coords)
    frac = out_coords - x0f
    i0 = jnp.clip(x0f.astype(jnp.int32), 0, in_size - 1)
    i1 = jnp.clip(x0f.astype(jnp.int32) + 1, 0, in_size - 1)
    rows = jnp.arange(out_size)
    w = jnp.zeros((n_rows, in_size), dtype=jnp.float32)
    w = w.at[rows, i0].add(1.0 - frac)
    w = w.at[rows, i1].add(frac)
    return w


def _finalize(vals, out_dtype):
    # Round + clip for integer image dtypes (PyTorch rounds; astype truncates).
    if jnp.issubdtype(out_dtype, jnp.integer):
        info = jnp.iinfo(out_dtype)
        vals = jnp.clip(jnp.round(vals), info.min, info.max)
    return vals.astype(out_dtype)


def _resize_kernel(wh_ref, ww_ref, img_ref, out_ref, *, rows_first, compute_dtype):
    # wh_ref : (new_h_pad, H)      row-interpolation weights (compute dtype)
    # ww_ref : (W, new_w_pad)      col-interpolation weights, transposed
    # img_ref: (tb, H, W)          tb images of the flattened batch
    # out_ref: (tb, new_h, new_w)  exact-size output block
    tb, in_h, in_w = img_ref.shape
    _, out_h, out_w = out_ref.shape
    wh = wh_ref[...]
    ww = ww_ref[...]
    new_h_pad = wh.shape[0]
    new_w_pad = ww.shape[1]

    # One wide cast per grid step (not per image).
    img = img_ref[...].astype(compute_dtype)
    # Small row-weight matrix broadcast once for the batched weight-side matmul.
    wh_b = jnp.broadcast_to(wh, (tb, new_h_pad, in_h))

    if rows_first:
        # Small weight-side matmul (batched), then the data-heavy matmul with the
        # batch folded into M (tb*new_h_pad rows feed the MXU).
        tmp = jnp.einsum("boh,bhw->bow", wh_b, img,
                         preferred_element_type=jnp.float32)        # (tb, new_h_pad, W)
        tmp = tmp.astype(compute_dtype).reshape(tb * new_h_pad, in_w)
        out = jnp.dot(tmp, ww, preferred_element_type=jnp.float32)  # folded big matmul
        out = out.reshape(tb, new_h_pad, new_w_pad)
    else:
        # Data-heavy matmul first with batch folded into M (tb*H rows), then the
        # small weight-side matmul (batched).
        tmp = jnp.dot(img.reshape(tb * in_h, in_w), ww,
                      preferred_element_type=jnp.float32)           # (tb*H, new_w_pad)
        tmp = tmp.astype(compute_dtype).reshape(tb, in_h, new_w_pad)
        out = jnp.einsum("boh,bhw->bow", wh_b, tmp,
                         preferred_element_type=jnp.float32)        # (tb, new_h_pad, new_w_pad)

    # Exact-size (masked where unaligned) store: no padded HBM writeback and no
    # wrapper de-pad slice.
    out_ref[...] = _finalize(out[:, :out_h, :out_w], out_ref.dtype)


def _hw_params():
    try:
        vmem_cap = int(pltpu.get_tpu_info().vmem_capacity_bytes)
    except Exception:
        vmem_cap = 128 * 1024 * 1024
    try:
        kind = jax.devices()[0].device_kind.lower()
    except Exception:
        kind = ""
    # MXU geometry: 128-wide on <= v5, 256-wide on v6e/v7x.
    mxu = 128 if any(t in kind for t in ("v2", "v3", "v4", "v5")) else 256
    is_v7x = ("v7" in kind) or ("7x" in kind) or (vmem_cap <= 96 * 1024 * 1024)
    return vmem_cap, mxu, is_v7x


@functools.partial(jax.jit, static_argnames=("short_edge_size",))
def short_edge_resize(imgs, *, short_edge_size):
    """Pallas implementation of ShortEdgeResize.forward for (..., H, W) inputs."""
    *lead, org_h, org_w = imgs.shape
    new_h, new_w = _target_size(org_h, org_w, short_edge_size)

    # MXU-friendly padded weight dims (padded rows/cols are zero); the stored
    # output itself is exact (new_h, new_w).
    new_h_pad = _round_up(new_h, 16)
    new_w_pad = _round_up(new_w, 128)

    b = 1
    for d in lead:
        b *= d
    x = imgs.reshape(b, org_h, org_w)

    # f32 MXU path for float imagery (no explicit bf16 casting), bf16 for
    # integer/bf16 imagery; f32 accumulation either way.
    if jnp.issubdtype(imgs.dtype, jnp.floating) and imgs.dtype != jnp.bfloat16:
        compute_dtype = jnp.float32
    else:
        compute_dtype = jnp.bfloat16

    wh = _bilinear_matrix(org_h, new_h, pad_out=new_h_pad).astype(compute_dtype)    # (new_h_pad, H)
    ww = _bilinear_matrix(org_w, new_w, pad_out=new_w_pad).T.astype(compute_dtype)  # (W, new_w_pad)

    vmem_cap, mxu, is_v7x = _hw_params()
    if is_v7x:
        # v7x: 64 MiB VMEM / TensorCore -> smaller blocks, keep compiler headroom.
        vmem_budget = 24 * 1024 * 1024
        vmem_limit_cap = 48 * 1024 * 1024
    else:
        # v5e / v6e: 128 MiB VMEM -> big blocks, push toward the HBM roofline.
        vmem_budget = 80 * 1024 * 1024
        vmem_limit_cap = 100 * 1024 * 1024

    item_in = x.dtype.itemsize
    item_out = item_in
    item_c = jnp.dtype(compute_dtype).itemsize
    weight_bytes = item_c * (new_h_pad * org_h + org_w * new_w_pad)
    # Single-buffer the grid-constant weights only when the saving matters.
    single_buffer_weights = weight_bytes > (2 * 1024 * 1024)
    weight_bufs = 1 if single_buffer_weights else 2

    def block_bytes(tb, rows_first):
        bb = 2 * tb * org_h * org_w * item_in               # input block, double-buffered
        bb += 2 * tb * new_h * new_w * item_out             # output block, double-buffered
        bb += weight_bufs * weight_bytes                    # interpolation weights
        bb += tb * org_h * org_w * item_c                   # image cast to compute dtype
        bb += tb * new_h_pad * org_h * item_c               # broadcast row weights
        if rows_first:
            bb += tb * new_h_pad * org_w * (4 + item_c)     # intermediate (f32 + cast)
        else:
            bb += tb * org_h * new_w_pad * (4 + item_c)
        bb += tb * new_h_pad * new_w_pad * 4                # folded-matmul f32 result
        bb += tb * new_h * new_w * (4 + item_out)           # de-padded + finalized
        return bb

    def _passes(m, k, n):
        c = lambda a: -(-a // mxu)
        return c(m) * c(k) * c(n)

    def mxu_passes(tb, rows_first):
        if rows_first:
            return tb * _passes(new_h_pad, org_h, org_w) + _passes(tb * new_h_pad, org_w, new_w_pad)
        return _passes(tb * org_h, org_w, new_w_pad) + tb * _passes(new_h_pad, org_h, new_w_pad)

    tb_cap = min(b, 32)
    if is_v7x and b >= 2:
        # Keep grid >= 2 so ("parallel",) can shard the batch over both TCs.
        tb_cap = min(tb_cap, -(-b // 2))

    tb, rows_first = 1, True
    for cand in range(tb_cap, 0, -1):
        feasible = [o for o in (True, False) if block_bytes(cand, o) <= vmem_budget]
        if feasible:
            tb = cand
            rows_first = min(feasible, key=lambda o: mxu_passes(cand, o))
            break
    else:
        # TODO(synk): huge single frames need an H/W-chunk grid axis + f32 VMEM
        # accumulator; here tb just degrades to 1.
        rows_first = mxu_passes(1, True) <= mxu_passes(1, False)

    need = block_bytes(tb, rows_first)
    vmem_limit = max(32 * 1024 * 1024, min(vmem_limit_cap, 2 * need))
    vmem_limit = int(min(max(vmem_limit, need + need // 4),
                         max(32 * 1024 * 1024, vmem_cap - 8 * 1024 * 1024)))

    grid = (pl.cdiv(b, tb),)  # ragged tail handled by masked reads/writes

    def _weight_spec(shape):
        if single_buffer_weights:
            try:
                return pl.BlockSpec(shape, lambda i: (0, 0),
                                    pipeline_mode=pl.Buffered(1))
            except Exception:
                pass
        return pl.BlockSpec(shape, lambda i: (0, 0))

    kernel = functools.partial(_resize_kernel, rows_first=rows_first,
                               compute_dtype=compute_dtype)

    out = pl.pallas_call(
        kernel,
        out_shape=jax.ShapeDtypeStruct((b, new_h, new_w), imgs.dtype),
        grid_spec=pltpu.PrefetchScalarGridSpec(
            num_scalar_prefetch=0,
            grid=grid,
            in_specs=[
                _weight_spec((new_h_pad, org_h)),
                _weight_spec((org_w, new_w_pad)),
                pl.BlockSpec((tb, org_h, org_w), lambda i: (i, 0, 0)),
            ],
            out_specs=pl.BlockSpec((tb, new_h, new_w), lambda i: (i, 0, 0)),
        ),
        compiler_params=pltpu.CompilerParams(
            dimension_semantics=("parallel",),
            vmem_limit_bytes=vmem_limit,
        ),
    )(wh, ww, x)

    return out.reshape(*lead, new_h, new_w)


def _reference_resize_f32(imgs, short_edge_size):
    """Pure-JAX f32 reference (same separable bilinear) for sanity checks."""
    *lead, org_h, org_w = imgs.shape
    new_h, new_w = _target_size(org_h, org_w, short_edge_size)
    wh = _bilinear_matrix(org_h, new_h)
    ww = _bilinear_matrix(org_w, new_w)
    xf = imgs.reshape(-1, org_h, org_w).astype(jnp.float32)
    out = jnp.einsum("oh,bhw,pw->bop", wh, xf, ww)
    return out.reshape(*lead, new_h, new_w)


if __name__ == "__main__":
    key = jax.random.PRNGKey(0)
    k1, k2, k3 = jax.random.split(key, 3)

    # Case 1: NCHW float32 landscape input -> f32 MXU path, batched grid blocks.
    x1 = jax.random.normal(k1, (2, 4, 16, 24), dtype=jnp.float32)
    y1 = jax.block_until_ready(short_edge_resize(x1, short_edge_size=8))
    r1 = _reference_resize_f32(x1, 8)
    assert y1.shape == (2, 4, 8, 12), y1.shape
    assert jnp.allclose(y1, r1, atol=5e-2, rtol=5e-2), float(jnp.max(jnp.abs(y1 - r1)))

    # Case 2: very wide float32 image -> cols-first folded matmul.
    x2 = jax.random.normal(k2, (2, 16, 512), dtype=jnp.float32)
    y2 = jax.block_until_ready(short_edge_resize(x2, short_edge_size=8))
    r2 = _reference_resize_f32(x2, 8)
    assert y2.shape == (2, 8, 256), y2.shape
    assert jnp.allclose(y2, r2, atol=5e-2, rtol=5e-2), float(jnp.max(jnp.abs(y2 - r2)))

    # Case 3: uint8 portrait, odd batch -> bf16 MXU path, round/clip, cdiv tail.
    x3 = jax.random.randint(k3, (3, 24, 16), 0, 256, dtype=jnp.int32).astype(jnp.uint8)
    y3 = jax.block_until_ready(short_edge_resize(x3, short_edge_size=8))
    r3 = jnp.clip(jnp.round(_reference_resize_f32(x3.astype(jnp.float32), 8)), 0, 255)
    assert y3.shape == (3, 12, 8), y3.shape
    assert int(jnp.max(jnp.abs(y3.astype(jnp.int32) - r3.astype(jnp.int32)))) <= 1

    print("KERNEL_OK")
</pallas_src>

<mosaic_0001>
module attributes {stable_mosaic.version = 11 : i64} {
  func.func @_resize_kernel(%arg0: i32, %arg1: memref<16x16xf32, #tpu.memory_space<vmem>>, %arg2: memref<24x128xf32, #tpu.memory_space<vmem>>, %arg3: memref<8x16x24xf32, #tpu.memory_space<vmem>>, %arg4: memref<8x8x12xf32, #tpu.memory_space<vmem>>) attributes {dimension_semantics = [#tpu.dimension_semantics<parallel>], iteration_bounds = array<i64: 1>, scalar_prefetch = 0 : i64, scratch_operands = 0 : i64, tpu.core_type = #tpu.core_type<tc>, window_params = [{pipeline_mode = #tpu.pipeline_mode<synchronous>, transform_indices = @transform_0, window_bounds = array<i64: 16, 16>}, {pipeline_mode = #tpu.pipeline_mode<synchronous>, transform_indices = @transform_1, window_bounds = array<i64: 24, 128>}, {transform_indices = @transform_2, window_bounds = array<i64: 8, 16, 24>}, {transform_indices = @transform_3, window_bounds = array<i64: 8, 8, 12>}]} {
    %c0 = arith.constant 0 : index
    %c0_0 = arith.constant 0 : index
    %0 = vector.load %arg1[%c0, %c0_0] : memref<16x16xf32, #tpu.memory_space<vmem>>, vector<16x16xf32>
    %c0_1 = arith.constant 0 : index
    %c0_2 = arith.constant 0 : index
    %1 = vector.load %arg2[%c0_1, %c0_2] : memref<24x128xf32, #tpu.memory_space<vmem>>, vector<24x128xf32>
    %c0_3 = arith.constant 0 : index
    %c0_4 = arith.constant 0 : index
    %c0_5 = arith.constant 0 : index
    %2 = vector.load %arg3[%c0_3, %c0_4, %c0_5] : memref<8x16x24xf32, #tpu.memory_space<vmem>>, vector<8x16x24xf32>
    %3 = vector.shape_cast %0 : vector<16x16xf32> to vector<1x16x16xf32>
    %4 = vector.broadcast %3 : vector<1x16x16xf32> to vector<8x16x16xf32>
    "tpu.trace_start"() <{level = 10 : i32, message = "boh,bhw->bow"}> : () -> ()
    %cst = arith.constant dense<0.000000e+00> : vector<8x16x24xf32>
    %5 = tpu.matmul %4, %2, %cst {dimension_numbers = #tpu.dot_dimension_numbers<[2], [1], [1], [2], [0, 0, 0, 1, 1, 2], [0], [0]>} : vector<8x16x16xf32>, vector<8x16x24xf32>, vector<8x16x24xf32> -> vector<8x16x24xf32>
    "tpu.trace_stop"() : () -> ()
    %6 = vector.shape_cast %5 : vector<8x16x24xf32> to vector<128x24xf32>
    %cst_6 = arith.constant dense<0.000000e+00> : vector<128x128xf32>
    %7 = tpu.matmul %6, %1, %cst_6 {dimension_numbers = #tpu.dot_dimension_numbers<[1], [0], [0], [1], [0, 0, 1, 1], [], []>} : vector<128x24xf32>, vector<24x128xf32>, vector<128x128xf32> -> vector<128x128xf32>
    %8 = vector.shape_cast %7 : vector<128x128xf32> to vector<8x16x128xf32>
    %9 = vector.extract_strided_slice %8 {offsets = [0, 0, 0], sizes = [8, 8, 12], strides = [1, 1, 1]} : vector<8x16x128xf32> to vector<8x8x12xf32>
    %c0_7 = arith.constant 0 : index
    %c0_8 = arith.constant 0 : index
    %c0_9 = arith.constant 0 : index
    %10 = vector.load %arg4[%c0_7, %c0_8, %c0_9] : memref<8x8x12xf32, #tpu.memory_space<vmem>>, vector<8x8x12xf32>
    tpu.vector_store %arg4[%c0_7, %c0_8, %c0_9], %9 {strides = array<i32>} : memref<8x8x12xf32, #tpu.memory_space<vmem>>, vector<8x8x12xf32>,
    return
  }
  func.func @transform_0(%arg0: i32) -> (i32, i32) {
    %c0_i32 = arith.constant 0 : i32
    %c0_i32_0 = arith.constant 0 : i32
    %c0_i32_1 = arith.constant 0 : i32
    return %c0_i32, %c0_i32_0 : i32, i32
  }
  func.func @transform_1(%arg0: i32) -> (i32, i32) {
    %c0_i32 = arith.constant 0 : i32
    %c0_i32_0 = arith.constant 0 : i32
    %c0_i32_1 = arith.constant 0 : i32
    return %c0_i32, %c0_i32_0 : i32, i32
  }
  func.func @transform_2(%arg0: i32) -> (i32, i32, i32) {
    %c0_i32 = arith.constant 0 : i32
    %c0_i32_0 = arith.constant 0 : i32
    %c0_i32_1 = arith.constant 0 : i32
    return %arg0, %c0_i32, %c0_i32_0 : i32, i32, i32
  }
  func.func @transform_3(%arg0: i32) -> (i32, i32, i32) {
    %c0_i32 = arith.constant 0 : i32
    %c0_i32_0 = arith.constant 0 : i32
    %c0_i32_1 = arith.constant 0 : i32
    return %arg0, %c0_i32, %c0_i32_0 : i32, i32, i32
  }
}

</mosaic_0001>

<bundles_post_ra>
// kernel: short_edge_resize.1
= control target key start
LH: loop header
LB: loop body
LE: loop exit
PB: predicated region body
PF: predicated region fallthrough
CT: control target
= control target key end

     0   :  { %vm36_vm0 = vcmask 130048   ;;  %s1228_s0 = inlined_call_operand.vmem [shape: f32[16,16], index: 0, kind: input, shape index: {}]   ;;  %s1229_s1 = inlined_call_operand.vmem [shape: f32[24,128], index: 1, kind: input, shape index: {}]   ;;  %s1230_s2 = inlined_call_operand.vmem [shape: f32[8,16,24], index: 2, kind: input, shape index: {}]   ;;  %s1231_s3 = inlined_call_operand.hbm [shape: f32[8,8,12], index: 3, kind: output, shape index: {}]  }
   0x1   :  { %v20_v0 = vld [vmem:[%s1230_s2] sm:$0xff]  ;;  %v21_v1 = vld [vmem:[%s1230_s2 + $0x8] sm:$0xff]  ;;  %v22_v4 = vld [vmem:[%s1230_s2 + $0x10] sm:$0xff] }
   0x2   :  { %v15_v2 = vld [vmem:[%s1228_s0] sm:$0xff]  ;;  %v1023_v3 = vpack.c.bf16 %v21_v1, %v20_v0  ;;  %v23_v5 = vld [vmem:[%s1230_s2 + $0x18] sm:$0xff]  ;;  %v25_v8 = vld [vmem:[%s1230_s2 + $0x28] sm:$0xff] }
   0x3   :  { %941 = vmatprep.mubr.msk.f32.mxu0 %vm36_vm0, %v15_v2  ;;  %948 = vmatprep.mubr.msk.f32.mxu1 %vm36_vm0, %v15_v2  ;;  %v1027_v6 = vpack.c.bf16 %v23_v5, %v22_v4  ;;  %v24_v7 = vld [vmem:[%s1230_s2 + $0x20] sm:$0xff]  ;;  %v26_v9 = vld [vmem:[%s1230_s2 + $0x30] sm:$0xff]  ;;  %v27_v11 = vld [vmem:[%s1230_s2 + $0x38] sm:$0xff] }
   0x4   :  { %1024 = vmatprep.subr.bf16.mxu0 %v1023_v3  ;;  %v1031_v10 = vpack.c.bf16 %v25_v8, %v24_v7  ;;  %v28_v12 = vld [vmem:[%s1230_s2 + $0x40] sm:$0xff]  ;;  %v29_v13 = vld [vmem:[%s1230_s2 + $0x48] sm:$0xff]  ;;  %v1035_v15 = vpack.c.bf16 %v27_v11, %v26_v9  ;;  %v30_v16 = vld [vmem:[%s1230_s2 + $0x50] sm:$0xff] }
   0x5   :  { %1026 = vmatpush3.bf16.msra.mxu0 %v1023_v3  ;;  %v16_v14 = vld [vmem:[%s1228_s0 + $0x8] sm:$0xff]  ;;  %1028 = vmatprep.subr.bf16.mxu1 %v1027_v6  ;;  %v31_v17 = vld [vmem:[%s1230_s2 + $0x58] sm:$0xff]  ;;  %v1039_v18 = vpack.c.bf16 %v29_v13, %v28_v12  ;;  %v32_v19 = vld [vmem:[%s1230_s2 + $0x60] sm:$0xff] }
   0x6   :  { %1032 = vmatprep.subr.bf16.mxu0 %v1031_v10  ;;  %1030 = vmatpush3.bf16.msra.mxu1 %v1027_v6  ;;  %v33_v20 = vld [vmem:[%s1230_s2 + $0x68] sm:$0xff] }
   0x7   :  { %1036 = vmatprep.subr.bf16.mxu1 %v1035_v15 }
   0x8   :  { %8 = vsyncpa [#allocation3], 0  ;;  %942 = vmatmul.mubr.msk.f32.vlgmr.msra.gmra.mrb[0].mxu0 %vm36_vm0, %v16_v14  ;;  %v1043_v21 = vpack.c.bf16 %v31_v17, %v30_v16  ;;  %v34_v22 = vld [vmem:[%s1230_s2 + $0x70] sm:$0xff]  ;;  %v35_v23 = vld [vmem:[%s1230_s2 + $0x78] sm:$0xff]  ;;  %v1047_v24 = vpack.c.bf16 %v33_v20, %v32_v19  ;;  %vm643_vm1 = vcmask 195584   ;;  %vm829_vm2 = vcmask 97280  }
   0x9   :  { %1034 = vmatpush3.bf16.msra.mxu0 %v1031_v10  ;;  %955 = vmatprep.mubr.msk.f32.mxu0 %vm36_vm0, %v15_v2  ;;  %v17_v25 = vld [vmem:[%s1229_s1] sm:$0xff]  ;;  %v18_v26 = vld [vmem:[%s1229_s1 + $0x8] sm:$0xff]  ;;  %v1051_v27 = vpack.c.bf16 %v35_v23, %v34_v22  ;;  %v19_v29 = vld [vmem:[%s1229_s1 + $0x10] sm:$0xff]  ;;  %s1090_s1 = smov [#allocation2]  }
   0xa   :  { %949 = vmatmul.mubr.msk.f32.vlgmr.msra.gmra.mrb[0].mxu1 %vm36_vm0, %v16_v14  ;;  %1040 = vmatprep.subr.bf16.mxu0 %v1039_v18  ;;  %v1055_v28 = vpack.c.bf16 %v18_v26, %v17_v25  ;;  %s843_s25 = sshll.u32 %s1090_s1, 4  ;;  %s844_s25 = int_to_ptr.vmem [resolvable:$true] %s843_s25 }
   0xb   :  { %1038 = vmatpush3.bf16.msra.mxu1 %v1035_v15  ;;  %962 = vmatprep.mubr.msk.f32.mxu1 %vm36_vm0, %v15_v2  ;;  %s1066_s26 = scalar_lea.vmem %s844_s25, 1024  ;;  %p1071_p1 = scmp.lt.s32.totalorder %s844_s25, %s844_s25 }
   0xc   :  { %956 = vmatmul.mubr.msk.f32.vlgmr.msra.gmra.mrb[2].mxu0 %vm36_vm0, %v16_v14  ;;  %1044 = vmatprep.subr.bf16.mxu1 %v1043_v21  ;;  %p1067_p0 = scmp.ne.s32.totalorder %s844_s25, %s1066_s26  ;;  %p1072_p2 = scmp.lt.s32.totalorder %s1066_s26, %s1066_s26 }
   0xd   :  { %1042 = vmatpush3.bf16.msra.mxu0 %v1039_v18  ;;  %969 = vmatprep.mubr.msk.f32.mxu0 %vm36_vm0, %v15_v2 }
   0xe   :  { %963 = vmatmul.mubr.msk.f32.vlgmr.msra.gmra.mrb[2].mxu1 %vm36_vm0, %v16_v14  ;;  %1048 = vmatprep.subr.bf16.mxu0 %v1047_v24  ;;  %p1073_p3 = por %p1072_p2, %p1071_p1 }
   0xf   :  { %1046 = vmatpush3.bf16.msra.mxu1 %v1043_v21  ;;  %976 = vmatprep.mubr.msk.f32.mxu1 %vm36_vm0, %v15_v2 }
  0x10   :  { %970 = vmatmul.mubr.msk.f32.vlgmr.msra.gmra.mrb[4].mxu0 %vm36_vm0, %v16_v14  ;;  %1052 = vmatprep.subr.bf16.mxu1 %v1051_v27  ;;  %p1074_p4 = pnand %p1073_p3, %p1067_p0 }
  0x11   :  { %1050 = vmatpush3.bf16.msra.mxu0 %v1047_v24  ;;  %983 = vmatprep.mubr.msk.f32.mxu0 %vm36_vm0, %v15_v2 }
  0x12   :  { %977 = vmatmul.mubr.msk.f32.vlgmr.msra.gmra.mrb[4].mxu1 %vm36_vm0, %v16_v14  ;;  %1056 = vmatprep.subr.bf16.mxu0 %v1055_v28 }
  0x13   :  { %1054 = vmatpush3.bf16.msra.mxu1 %v1051_v27  ;;  %990 = vmatprep.mubr.msk.f32.mxu1 %vm36_vm0, %v15_v2 }
  0x14   :  { %984 = vmatmul.mubr.msk.f32.vlgmr.msra.gmra.mrb[6].mxu0 %vm36_vm0, %v16_v14  ;;  %1059 = vmatprep.subr.bf16.mxu1 %v1055_v28 }
  0x15   :  { %1058 = vmatpush3.bf16.msra.mxu0 %v1055_v28 }
  0x16   :  { %991 = vmatmul.mubr.msk.f32.vlgmr.msra.gmra.mrb[6].mxu1 %vm36_vm0, %v16_v14  ;;  %997 = vmatprep.subr.mxu0 %v19_v29 }
  0x17   :  { %1061 = vmatpush3.bf16.msra.mxu1 %v1055_v28 }
  0x18   :  { %1060 = vmatprep.subr.mxu1 %v19_v29 }
  0x19   :  { %998 = vmatpush3.msra.mxu0 %v19_v29 }
  0x1b   :  { %1062 = vmatpush3.msra.mxu1 %v19_v29 }
  0xdb   :  { %v943_v30 = vpop.f32.mrb[0].mxu0 }
  0xdc   :  { %v109_v31 = vpop.f32.mrb[1].mxu0 }
  0xdd   :  { %999 = vmatprep.mubr.msk.f32.mxu0 %vm643_vm1, %v109_v31  ;;  %v950_v32 = vpop.f32.mrb[0].mxu1 }
  0xde   :  { %1000 = vmatmul.mubr.msk.f32.vlgmr.msra.gmra.mrb[8].mxu0 %vm643_vm1, %v943_v30  ;;  %v184_v33 = vpop.f32.mrb[1].mxu1 }
  0xdf   :  { %v957_v34 = vpop.f32.mrb[2].mxu0  ;;  %1002 = vmatprep.mubr.msk.f32.mxu0 %vm643_vm1, %v184_v33 }
  0xe0   :  { %v259_v35 = vpop.f32.mrb[3].mxu0 }
  0xe1   :  { %v964_v36 = vpop.f32.mrb[2].mxu1 }
  0xe2   :  { %1003 = vmatmul.mubr.msk.f32.gmra.mrb[10].mxu0 %vm643_vm1, %v950_v32  ;;  %v334_v37 = vpop.f32.mrb[3].mxu1 }
  0xe3   :  { %v971_v38 = vpop.f32.mrb[4].mxu0  ;;  %1005 = vmatprep.mubr.msk.f32.mxu0 %vm643_vm1, %v259_v35 }
  0xe4   :  { %v409_v39 = vpop.f32.mrb[5].mxu0 }
  0xe5   :  { %1011 = vmatprep.mubr.msk.f32.mxu1 %vm643_vm1, %v409_v39  ;;  %v978_v40 = vpop.f32.mrb[4].mxu1 }
  0xe6   :  { %1006 = vmatmul.mubr.msk.f32.gmra.mrb[12].mxu0 %vm643_vm1, %v957_v34  ;;  %1012 = vmatmul.mubr.msk.f32.vlgmr.msra.gmra.mrb[8].mxu1 %vm643_vm1, %v971_v38  ;;  %v484_v41 = vpop.f32.mrb[5].mxu1 }
  0xe7   :  { %1008 = vmatprep.mubr.msk.f32.mxu0 %vm643_vm1, %v334_v37  ;;  %1014 = vmatprep.mubr.msk.f32.mxu1 %vm643_vm1, %v484_v41  ;;  %v985_v42 = vpop.f32.mrb[6].mxu0 }
  0xe8   :  { %v559_v43 = vpop.f32.mrb[7].mxu0 }
  0xe9   :  { %v992_v44 = vpop.f32.mrb[6].mxu1 }
  0xea   :  { %1009 = vmatmul.mubr.msk.f32.gmra.mrb[14].mxu0 %vm643_vm1, %v964_v36  ;;  %1015 = vmatmul.mubr.msk.f32.gmra.mrb[10].mxu1 %vm643_vm1, %v978_v40  ;;  %v634_v45 = vpop.f32.mrb[7].mxu1 }
  0xeb   :  { %1017 = vmatprep.mubr.msk.f32.mxu1 %vm643_vm1, %v559_v43 }
  0xee   :  { %1018 = vmatmul.mubr.msk.f32.gmra.mrb[12].mxu1 %vm643_vm1, %v985_v42 }
  0xef   :  { %1020 = vmatprep.mubr.msk.f32.mxu1 %vm643_vm1, %v634_v45 }
  0xf2   :  { %1021 = vmatmul.mubr.msk.f32.gmra.mrb[14].mxu1 %vm643_vm1, %v992_v44 }
 0x1b1   :  { %v1001_v46 = vpop.f32.mrb[8].mxu0 }
 0x1b2   :  { %v758_v47 = vpop.f32.mrb[9].mxu0 }
 0x1b3   :  { %830 = vst.msk [vmem:[#allocation2] sm:$0xff] %vm829_vm2, %v758_v47 }
 0x1b5   :  { %v1004_v48 = vpop.f32.mrb[10].mxu0 }
 0x1b6   :  { %v767_v49 = vpop.f32.mrb[11].mxu0 }
 0x1b7   :  { %831 = vst.msk [vmem:[#allocation2 + $0x8] sm:$0xff] %vm829_vm2, %v767_v49 }
 0x1b9   :  { %v1007_v50 = vpop.f32.mrb[12].mxu0  ;;  %v1013_v51 = vpop.f32.mrb[8].mxu1 }
 0x1ba   :  { %v776_v52 = vpop.f32.mrb[13].mxu0  ;;  %v794_v53 = vpop.f32.mrb[9].mxu1 }
 0x1bb   :  { %832 = vst.msk [vmem:[#allocation2 + $0x10] sm:$0xff] %vm829_vm2, %v776_v52  ;;  %834 = vst.msk [vmem:[#allocation2 + $0x20] sm:$0xff] %vm829_vm2, %v794_v53 }
 0x1bd   :  { %v1010_v54 = vpop.f32.mrb[14].mxu0  ;;  %v1016_v55 = vpop.f32.mrb[10].mxu1 }
 0x1be   :  { %v785_v56 = vpop.f32.mrb[15].mxu0  ;;  %v803_v57 = vpop.f32.mrb[11].mxu1 }
 0x1bf   :  { %833 = vst.msk [vmem:[#allocation2 + $0x18] sm:$0xff] %vm829_vm2, %v785_v56  ;;  %835 = vst.msk [vmem:[#allocation2 + $0x28] sm:$0xff] %vm829_vm2, %v803_v57 }
 0x1c1   :  { %v1019_v58 = vpop.f32.mrb[12].mxu1 }
 0x1c2   :  { %v812_v59 = vpop.f32.mrb[13].mxu1 }
 0x1c3   :  { %836 = vst.msk [vmem:[#allocation2 + $0x30] sm:$0xff] %vm829_vm2, %v812_v59 }
 0x1c5   :  { %v1022_v60 = vpop.f32.mrb[14].mxu1 }
 0x1c6   :  { %v821_v61 = vpop.f32.mrb[15].mxu1 }
 0x1c7   :  { %837 = vst.msk [vmem:[#allocation2 + $0x38] sm:$0xff] %vm829_vm2, %v821_v61 }
 0x1c8   :  { %1077 = shalt.err (!%p1074_p4)
}
 0x1c9   :  { %s1078_s29 = scalar_lea.hbm %s1231_s3, 1024 }
 0x1ca   :  { %p1079_p5 = scmp.ne.s32.totalorder %s1231_s3, %s1078_s29  ;;  %p1082_p6 = scmp.lt.u32.totalorder %s1078_s29, %s1231_s3 }
 0x1cc   :  { %p1084_p7 = pnand %p1082_p6, %p1079_p5 }
 0x1ce   :  { %1087 = shalt.err (!%p1084_p7)
}
 0x1cf   :  { %s1091_s7 = smov 128   ;;  %s1092_s8 = smov 8  }
 0x1d0   :  { %849 = dma.vmem_to_hbm [thread:$0]  %s844_s25, 1024, %s1231_s3, [#allocation3], %s1091_s7, %s1091_s7, %s1092_s8  }
 0x1d1   :  { %1088 = dma.done.wait [#allocation3], 1024  }
 0x1d2   :  { %1089 = vsyncadd [#allocation3], 4294966272 }
 0x1d3   :  { %853 = vsyncpa [#allocation3], 1 }

</bundles_post_ra>
